<compile_context>
chip_gen: v6e
topology: v6e:2x2x1
jax: 0.10.0
libtpu: 0.0.40
codegen_flags: <defaults>
</compile_context>

<pallas_src>
import functools

import jax
import jax.numpy as jnp
from jax import lax
from jax.experimental import pallas as pl
from jax.experimental.pallas import tpu as pltpu

_LANES = 128


def _sublane_granularity(dtype):
    """Native sublane multiple for a packed dtype: f32/i32 -> 8, bf16 -> 16, i8 -> 32."""
    itemsize = jnp.dtype(dtype).itemsize
    return 8 * max(1, 4 // itemsize)


def _miou_kernel(x_ref, t_ref, out_ref, *, n_classes, tile_t, row_chunk,
                 t_valid, ragged):
    """Streaming per-class intersection / union partial sums.

    x_ref:   (1, C, tile_t, 128) logits tile (any float dtype, upcast to f32)
    t_ref:   (1, tile_t, 128)    integer class labels tile
    out_ref: (1, 1, 2*C, 128)    per-lane partial sums; rows [0,C) = inter,
                                 rows [C,2C) = union.  Resident across the
                                 spatial grid axis (accumulator output).
    """
    C = n_classes
    k = pl.program_id(2)

    @pl.when(k == 0)
    def _init():
        out_ref[...] = jnp.zeros_like(out_ref)

    if ragged:
        # Global spatial block index (spatial-split axis s is the slow axis).
        g = pl.program_id(0) * pl.num_programs(2) + k
        row0 = g * tile_t
    else:
        row0 = 0  # unused

    def accumulate(row_start, nrows):
        """Process rows [row_start, row_start+nrows) of this tile and add the
        per-lane partials into out_ref.  nrows is static, so live exp/prob
        slabs stay small (no VMEM spills even with large DMA tiles)."""
        sl = pl.ds(row_start, nrows)
        xs = [x_ref[0, c, sl, :].astype(jnp.float32) for c in range(C)]
        t = t_ref[0, sl, :]

        # Numerically-stable softmax over the (unrolled) class axis.
        m = xs[0]
        for c in range(1, C):
            m = jnp.maximum(m, xs[c])
        es = [jnp.exp(xc - m) for xc in xs]
        denom = es[0]
        for c in range(1, C):
            denom = denom + es[c]
        # EUP approx reciprocal + one Newton refinement (cheaper than exact
        # divide; relative error well inside the test tolerance).
        r = pl.reciprocal(denom, approx=True)
        inv = r * (2.0 - denom * r)

        if ragged:
            rows = lax.broadcasted_iota(jnp.int32, (nrows, _LANES), 0)
            valid = (row0 + row_start + rows) < t_valid

        inter_rows = []
        union_rows = []
        for c in range(C):
            p_c = es[c] * inv                      # softmax prob, class c
            oh_c = (t == c)                        # one-hot slab, class c
            if ragged:
                # select (not multiply) so NaN/Inf garbage in OOB rows is dropped
                p_c = jnp.where(valid, p_c, 0.0)
                oh_c = jnp.logical_and(oh_c, valid)
            oh_f = oh_c.astype(jnp.float32)
            inter_l = jnp.sum(p_c * oh_f, axis=0, keepdims=True)   # (1, 128)
            psum_l = jnp.sum(p_c, axis=0, keepdims=True)
            cnt_l = jnp.sum(oh_f, axis=0, keepdims=True)
            inter_rows.append(inter_l)
            union_rows.append(psum_l + cnt_l - inter_l)   # union w/o full tensor

        upd = jnp.concatenate(inter_rows + union_rows, axis=0)      # (2C, 128)
        out_ref[0, 0, :, :] = out_ref[0, 0, :, :] + upd

    if tile_t <= row_chunk:
        accumulate(0, tile_t)
    else:
        n_full = tile_t // row_chunk
        rem = tile_t % row_chunk

        @pl.loop(0, n_full)
        def _chunks(j):
            accumulate(pl.multiple_of(j * row_chunk, row_chunk), row_chunk)

        if rem:
            accumulate(n_full * row_chunk, rem)


def _kernel_partial_sums(x, t, n_classes, max_tile_t, row_chunk):
    """Run the kernel over lane-aligned pixels.

    x: (N, C, t_total, 128) float logits; t: (N, t_total, 128) int labels.
    Returns (inter, union), each (N, C) float32.
    """
    N, C, t_total, _ = x.shape
    gran = max(_sublane_granularity(x.dtype), _sublane_granularity(t.dtype))

    if t_total <= max_tile_t:
        tile_t = t_total                      # single full-extent spatial tile
    else:
        tile_t = max(gran, (max_tile_t // gran) * gran)
    grid_k = pl.cdiv(t_total, tile_t)
    ragged = (t_total % tile_t) != 0 and grid_k > 1

    # Explicit spatial split so both v7x TensorCores stay busy when the batch
    # alone cannot be sharded evenly (N odd); free on other generations.
    splits = 2 if (N % 2 == 1 and grid_k >= 2 and grid_k % 2 == 0) else 1
    k_per_split = grid_k // splits

    kernel = functools.partial(
        _miou_kernel, n_classes=C, tile_t=tile_t, row_chunk=row_chunk,
        t_valid=t_total, ragged=ragged)

    out = pl.pallas_call(
        kernel,
        out_shape=jax.ShapeDtypeStruct((splits, N, 2 * C, _LANES), jnp.float32),
        grid=(splits, N, k_per_split),
        in_specs=[
            pl.BlockSpec((1, C, tile_t, _LANES),
                         lambda s, n, k: (n, 0, s * k_per_split + k, 0)),
            pl.BlockSpec((1, tile_t, _LANES),
                         lambda s, n, k: (n, s * k_per_split + k, 0)),
        ],
        out_specs=pl.BlockSpec((1, 1, 2 * C, _LANES),
                               lambda s, n, k: (s, n, 0, 0)),
        compiler_params=pltpu.CompilerParams(
            dimension_semantics=("parallel", "parallel", "arbitrary"),
        ),
    )(x, t)

    sums = jnp.sum(out, axis=(0, 3))          # reduce splits + lanes -> (N, 2C)
    return sums[:, :C], sums[:, C:]


def miou_loss(inputs, target, n_classes=3, max_tile_t=2048, row_chunk=64):
    """inputs: (N, C, H, W) float logits; target: (N, H, W) int labels.
    Returns the scalar mIoU loss: 1 - mean_{n,c}(inter / union)."""
    N, C, H, W = inputs.shape
    assert C == n_classes
    HW = H * W
    main = (HW // _LANES) * _LANES
    tail = HW - main

    x_flat = inputs.reshape(N, C, HW)
    t_flat = target.reshape(N, HW)

    inter = jnp.zeros((N, C), jnp.float32)
    union = jnp.zeros((N, C), jnp.float32)

    if main:
        # Lane-aligned bulk.  Free reshape when HW % 128 == 0; otherwise a
        # slice of the leading part (no full-tensor pad + no per-pixel mask).
        x_main = x_flat if tail == 0 else x_flat[:, :, :main]
        t_main = t_flat if tail == 0 else t_flat[:, :main]
        t_total = main // _LANES
        x_main = x_main.reshape(N, C, t_total, _LANES)
        t_main = t_main.reshape(N, t_total, _LANES)
        i_m, u_m = _kernel_partial_sums(x_main, t_main, C, max_tile_t, row_chunk)
        inter = inter + i_m
        union = union + u_m

    if tail:
        # Ragged (< 128 px / image) lane tail: tiny pure-JAX epilogue.
        x_t = x_flat[:, :, main:].astype(jnp.float32)
        t_t = t_flat[:, main:]
        p = jax.nn.softmax(x_t, axis=1)
        oh = jax.nn.one_hot(t_t, C, axis=1, dtype=jnp.float32)
        inter = inter + jnp.sum(p * oh, axis=2)
        union = union + jnp.sum(p + oh - p * oh, axis=2)

    return 1.0 - jnp.mean(inter / union)


def _miou_loss_ref(inputs, target, n_classes=3):
    """Pure-JAX reference mirroring the PyTorch module."""
    N, C, H, W = inputs.shape
    p = jax.nn.softmax(inputs.astype(jnp.float32), axis=1)
    one_hot = jax.nn.one_hot(target, n_classes, axis=1, dtype=jnp.float32)
    inter = (p * one_hot).reshape(N, C, -1).sum(axis=2)
    union = (p + one_hot - p * one_hot).reshape(N, C, -1).sum(axis=2)
    return 1.0 - jnp.mean(inter / union)


if __name__ == "__main__":
    key = jax.random.PRNGKey(0)

    # (shape, x dtype, t dtype, max_tile_t, tol) -- exercises: single tile,
    # multi-tile accumulation, ragged last tile + spatial split (N=1),
    # lane-tail epilogue, bf16 logits, int8 targets, inner chunk loop (+rem).
    cases = [
        ((2, 3, 16, 16), jnp.float32, jnp.int32, 2048, 1e-4),
        ((2, 3, 64, 64), jnp.float32, jnp.int32, 8, 1e-4),
        ((1, 3, 48, 32), jnp.float32, jnp.int32, 8, 1e-4),
        ((2, 3, 20, 26), jnp.float32, jnp.int32, 2048, 1e-4),
        ((2, 3, 32, 32), jnp.bfloat16, jnp.int32, 2048, 1e-4),
        ((2, 3, 128, 64), jnp.float32, jnp.int8, 32, 1e-4),
        ((1, 3, 128, 128), jnp.float32, jnp.int32, 2048, 1e-4),
        ((1, 3, 96, 128), jnp.float32, jnp.int32, 2048, 1e-4),
    ]
    for (N, C, H, W), x_dt, t_dt, max_tile_t, tol in cases:
        key, k1, k2 = jax.random.split(key, 3)
        inputs = jax.random.normal(k1, (N, C, H, W), dtype=jnp.float32).astype(x_dt)
        target = jax.random.randint(k2, (N, H, W), 0, C, dtype=jnp.int32).astype(t_dt)

        out = miou_loss(inputs, target, n_classes=C, max_tile_t=max_tile_t)
        out = jax.block_until_ready(out)
        ref = _miou_loss_ref(inputs, target, n_classes=C)
        assert jnp.allclose(out, ref, atol=tol, rtol=tol), (
            (N, C, H, W), x_dt, t_dt, out, ref)

    print("KERNEL_OK")
</pallas_src>

<mosaic_0001>
module attributes {stable_mosaic.version = 11 : i64} {
  func.func @_miou_kernel(%arg0: i32, %arg1: i32, %arg2: i32, %arg3: memref<1x3x2x128xf32, #tpu.memory_space<vmem>>, %arg4: memref<1x2x128xi32, #tpu.memory_space<vmem>>, %arg5: memref<1x1x6x128xf32, #tpu.memory_space<vmem>>) attributes {dimension_semantics = [#tpu.dimension_semantics<parallel>, #tpu.dimension_semantics<parallel>, #tpu.dimension_semantics<arbitrary>], iteration_bounds = array<i64: 1, 2, 1>, scalar_prefetch = 0 : i64, scratch_operands = 0 : i64, tpu.core_type = #tpu.core_type<tc>, window_params = [{transform_indices = @transform_0, window_bounds = array<i64: 1, 3, 2, 128>}, {transform_indices = @transform_1, window_bounds = array<i64: 1, 2, 128>}, {transform_indices = @transform_2, window_bounds = array<i64: 1, 1, 6, 128>}]} {
    %c0_i32 = arith.constant 0 : i32
    %0 = arith.cmpi eq, %arg2, %c0_i32 : i32
    %1 = arith.extui %0 : i1 to i32
    %c0_i32_0 = arith.constant 0 : i32
    %2 = arith.cmpi ne, %1, %c0_i32_0 : i32
    scf.if %2 {
      %cst_31 = arith.constant 0.000000e+00 : f32
      %75 = vector.broadcast %cst_31 : f32 to vector<1x1x6x128xf32>
      %c0_32 = arith.constant 0 : index
      %c0_33 = arith.constant 0 : index
      %c0_34 = arith.constant 0 : index
      %c0_35 = arith.constant 0 : index
      %76 = vector.load %arg5[%c0_32, %c0_33, %c0_34, %c0_35] : memref<1x1x6x128xf32, #tpu.memory_space<vmem>>, vector<1x1x6x128xf32>
      tpu.vector_store %arg5[%c0_32, %c0_33, %c0_34, %c0_35], %75 {strides = array<i32>} : memref<1x1x6x128xf32, #tpu.memory_space<vmem>>, vector<1x1x6x128xf32>,
    } else {
    }
    %c0 = arith.constant 0 : index
    %c0_1 = arith.constant 0 : index
    %c0_2 = arith.constant 0 : index
    %c0_3 = arith.constant 0 : index
    %3 = vector.load %arg3[%c0, %c0_1, %c0_2, %c0_3] : memref<1x3x2x128xf32, #tpu.memory_space<vmem>>, vector<1x1x2x128xf32>
    %4 = vector.shape_cast %3 : vector<1x1x2x128xf32> to vector<2x128xf32>
    %c0_4 = arith.constant 0 : index
    %c1 = arith.constant 1 : index
    %c0_5 = arith.constant 0 : index
    %c0_6 = arith.constant 0 : index
    %5 = vector.load %arg3[%c0_4, %c1, %c0_5, %c0_6] : memref<1x3x2x128xf32, #tpu.memory_space<vmem>>, vector<1x1x2x128xf32>
    %6 = vector.shape_cast %5 : vector<1x1x2x128xf32> to vector<2x128xf32>
    %c0_7 = arith.constant 0 : index
    %c2 = arith.constant 2 : index
    %c0_8 = arith.constant 0 : index
    %c0_9 = arith.constant 0 : index
    %7 = vector.load %arg3[%c0_7, %c2, %c0_8, %c0_9] : memref<1x3x2x128xf32, #tpu.memory_space<vmem>>, vector<1x1x2x128xf32>
    %8 = vector.shape_cast %7 : vector<1x1x2x128xf32> to vector<2x128xf32>
    %c0_10 = arith.constant 0 : index
    %c0_11 = arith.constant 0 : index
    %c0_12 = arith.constant 0 : index
    %9 = vector.load %arg4[%c0_10, %c0_11, %c0_12] : memref<1x2x128xi32, #tpu.memory_space<vmem>>, vector<1x2x128xi32>
    %10 = vector.shape_cast %9 : vector<1x2x128xi32> to vector<2x128xi32>
    %11 = arith.maximumf %4, %6 : vector<2x128xf32>
    %12 = arith.maximumf %11, %8 : vector<2x128xf32>
    %13 = arith.subf %4, %12 : vector<2x128xf32>
    %14 = math.exp %13 : vector<2x128xf32>
    %15 = arith.subf %6, %12 : vector<2x128xf32>
    %16 = math.exp %15 : vector<2x128xf32>
    %17 = arith.subf %8, %12 : vector<2x128xf32>
    %18 = math.exp %17 : vector<2x128xf32>
    %19 = arith.addf %14, %16 : vector<2x128xf32>
    %20 = arith.addf %19, %18 : vector<2x128xf32>
    %21 = tpu.reciprocal %20 {approx = true} : vector<2x128xf32> -> vector<2x128xf32>
    %22 = arith.mulf %20, %21 : vector<2x128xf32>
    %cst = arith.constant 2.000000e+00 : f32
    %23 = vector.broadcast %cst : f32 to vector<2x128xf32>
    %24 = arith.subf %23, %22 : vector<2x128xf32>
    %25 = arith.mulf %21, %24 : vector<2x128xf32>
    %26 = arith.mulf %14, %25 : vector<2x128xf32>
    %c0_i32_13 = arith.constant 0 : i32
    %27 = vector.broadcast %c0_i32_13 : i32 to vector<2x128xi32>
    %28 = arith.cmpi eq, %10, %27 : vector<2x128xi32>
    %29 = arith.extui %28 : vector<2x128xi1> to vector<2x128xi32>
    %30 = arith.sitofp %29 : vector<2x128xi32> to vector<2x128xf32>
    %31 = arith.mulf %26, %30 : vector<2x128xf32>
    %cst_14 = arith.constant dense<0.000000e+00> : vector<128xf32>
    %32 = vector.multi_reduction <add>, %31, %cst_14 [0] : vector<2x128xf32> to vector<128xf32>
    %33 = vector.shape_cast %32 : vector<128xf32> to vector<1x128xf32>
    %cst_15 = arith.constant dense<0.000000e+00> : vector<128xf32>
    %34 = vector.multi_reduction <add>, %26, %cst_15 [0] : vector<2x128xf32> to vector<128xf32>
    %35 = vector.shape_cast %34 : vector<128xf32> to vector<1x128xf32>
    %cst_16 = arith.constant dense<0.000000e+00> : vector<128xf32>
    %36 = vector.multi_reduction <add>, %30, %cst_16 [0] : vector<2x128xf32> to vector<128xf32>
    %37 = vector.shape_cast %36 : vector<128xf32> to vector<1x128xf32>
    %38 = arith.addf %35, %37 : vector<1x128xf32>
    %39 = arith.subf %38, %33 : vector<1x128xf32>
    %40 = arith.mulf %16, %25 : vector<2x128xf32>
    %c1_i32 = arith.constant 1 : i32
    %41 = vector.broadcast %c1_i32 : i32 to vector<2x128xi32>
    %42 = arith.cmpi eq, %10, %41 : vector<2x128xi32>
    %43 = arith.extui %42 : vector<2x128xi1> to vector<2x128xi32>
    %44 = arith.sitofp %43 : vector<2x128xi32> to vector<2x128xf32>
    %45 = arith.mulf %40, %44 : vector<2x128xf32>
    %cst_17 = arith.constant dense<0.000000e+00> : vector<128xf32>
    %46 = vector.multi_reduction <add>, %45, %cst_17 [0] : vector<2x128xf32> to vector<128xf32>
    %47 = vector.shape_cast %46 : vector<128xf32> to vector<1x128xf32>
    %cst_18 = arith.constant dense<0.000000e+00> : vector<128xf32>
    %48 = vector.multi_reduction <add>, %40, %cst_18 [0] : vector<2x128xf32> to vector<128xf32>
    %49 = vector.shape_cast %48 : vector<128xf32> to vector<1x128xf32>
    %cst_19 = arith.constant dense<0.000000e+00> : vector<128xf32>
    %50 = vector.multi_reduction <add>, %44, %cst_19 [0] : vector<2x128xf32> to vector<128xf32>
    %51 = vector.shape_cast %50 : vector<128xf32> to vector<1x128xf32>
    %52 = arith.addf %49, %51 : vector<1x128xf32>
    %53 = arith.subf %52, %47 : vector<1x128xf32>
    %54 = arith.mulf %18, %25 : vector<2x128xf32>
    %c2_i32 = arith.constant 2 : i32
    %55 = vector.broadcast %c2_i32 : i32 to vector<2x128xi32>
    %56 = arith.cmpi eq, %10, %55 : vector<2x128xi32>
    %57 = arith.extui %56 : vector<2x128xi1> to vector<2x128xi32>
    %58 = arith.sitofp %57 : vector<2x128xi32> to vector<2x128xf32>
    %59 = arith.mulf %54, %58 : vector<2x128xf32>
    %cst_20 = arith.constant dense<0.000000e+00> : vector<128xf32>
    %60 = vector.multi_reduction <add>, %59, %cst_20 [0] : vector<2x128xf32> to vector<128xf32>
    %61 = vector.shape_cast %60 : vector<128xf32> to vector<1x128xf32>
    %cst_21 = arith.constant dense<0.000000e+00> : vector<128xf32>
    %62 = vector.multi_reduction <add>, %54, %cst_21 [0] : vector<2x128xf32> to vector<128xf32>
    %63 = vector.shape_cast %62 : vector<128xf32> to vector<1x128xf32>
    %cst_22 = arith.constant dense<0.000000e+00> : vector<128xf32>
    %64 = vector.multi_reduction <add>, %58, %cst_22 [0] : vector<2x128xf32> to vector<128xf32>
    %65 = vector.shape_cast %64 : vector<128xf32> to vector<1x128xf32>
    %66 = arith.addf %63, %65 : vector<1x128xf32>
    %67 = arith.subf %66, %61 : vector<1x128xf32>
    %68 = tpu.concatenate %33, %47, %61, %39, %53, %67 in 0 : vector<1x128xf32>, vector<1x128xf32>, vector<1x128xf32>, vector<1x128xf32>, vector<1x128xf32>, vector<1x128xf32> -> vector<6x128xf32>
    %c0_23 = arith.constant 0 : index
    %c0_24 = arith.constant 0 : index
    %c0_25 = arith.constant 0 : index
    %c0_26 = arith.constant 0 : index
    %69 = vector.load %arg5[%c0_23, %c0_24, %c0_25, %c0_26] : memref<1x1x6x128xf32, #tpu.memory_space<vmem>>, vector<1x1x6x128xf32>
    %70 = vector.shape_cast %69 : vector<1x1x6x128xf32> to vector<6x128xf32>
    %71 = arith.addf %70, %68 : vector<6x128xf32>
    %c0_27 = arith.constant 0 : index
    %c0_28 = arith.constant 0 : index
    %c0_29 = arith.constant 0 : index
    %c0_30 = arith.constant 0 : index
    %72 = vector.load %arg5[%c0_27, %c0_28, %c0_29, %c0_30] : memref<1x1x6x128xf32, #tpu.memory_space<vmem>>, vector<1x1x6x128xf32>
    %73 = vector.shape_cast %72 : vector<1x1x6x128xf32> to vector<6x128xf32>
    %74 = vector.shape_cast %71 : vector<6x128xf32> to vector<1x1x6x128xf32>
    tpu.vector_store %arg5[%c0_27, %c0_28, %c0_29, %c0_30], %74 {strides = array<i32>} : memref<1x1x6x128xf32, #tpu.memory_space<vmem>>, vector<1x1x6x128xf32>,
    return
  }
  func.func @transform_0(%arg0: i32, %arg1: i32, %arg2: i32) -> (i32, i32, i32, i32) {
    %c1_i32 = arith.constant 1 : i32
    %0 = arith.muli %arg0, %c1_i32 : i32
    %1 = arith.addi %0, %arg2 : i32
    %c0_i32 = arith.constant 0 : i32
    %c0_i32_0 = arith.constant 0 : i32
    %c0_i32_1 = arith.constant 0 : i32
    return %arg1, %c0_i32, %1, %c0_i32_0 : i32, i32, i32, i32
  }
  func.func @transform_1(%arg0: i32, %arg1: i32, %arg2: i32) -> (i32, i32, i32) {
    %c1_i32 = arith.constant 1 : i32
    %0 = arith.muli %arg0, %c1_i32 : i32
    %1 = arith.addi %0, %arg2 : i32
    %c0_i32 = arith.constant 0 : i32
    %c0_i32_0 = arith.constant 0 : i32
    return %arg1, %1, %c0_i32 : i32, i32, i32
  }
  func.func @transform_2(%arg0: i32, %arg1: i32, %arg2: i32) -> (i32, i32, i32, i32) {
    %c0_i32 = arith.constant 0 : i32
    %c0_i32_0 = arith.constant 0 : i32
    %c0_i32_1 = arith.constant 0 : i32
    return %arg0, %arg1, %c0_i32, %c0_i32_0 : i32, i32, i32, i32
  }
}

</mosaic_0001>

<bundles_post_ra>
// kernel: tpu_custom_call.1
= control target key start
LH: loop header
LB: loop body
LE: loop exit
PB: predicated region body
PF: predicated region fallthrough
CT: control target
= control target key end

     0   :  { %7 = vsyncpa [#allocation3], 0  ;;  %s843_s0 = inlined_call_operand.hbm [shape: f32[2,3,2,128], index: 0, kind: input, shape index: {}]   ;;  %s844_s1 = inlined_call_operand.hbm [shape: s32[2,2,128], index: 1, kind: input, shape index: {}]   ;;  %s845_s2 = inlined_call_operand.vmem [shape: f32[1,2,6,128], index: 2, kind: output, shape index: {}]  }
   0x1   :  { %9 = vsyncpa [#allocation3 + $0x1], 0 }
   0x2   :  { %10 = vsyncpa [#allocation5], 0 }
   0x3   :  { %12 = vsyncpa [#allocation5 + $0x1], 0  ;;  %s710_s9 = smov 0   ;;  %s712_s10 = smov 0  }
   0x4   :  { %s714_s11 = smov 0   ;;  %s716_s12 = smov 0  }
   0x5   :  { %s718_s13 = smov 0   ;;  %s720_s14 = smov 0  }
   0x6 LB: > { %s487_s15 = sadd.s32 4294967295, %s688_s14   ;;  %s33_s16 = sadd.s32 1, %s684_s13  ;;  %s688_s14 = sphi %s720_s14, %s18_s14   ;;  %s684_s13 = sphi %s718_s13, %s853_s13   ;;  %s680_s12 = sphi %s716_s12, %s852_s12   ;;  %s676_s11 = sphi %s714_s11, %s851_s11   ;;  %s672_s10 = sphi %s712_s10, %s850_s10   ;;  %s668_s9 = sphi %s710_s9, %s849_s9  }
   0x7   : > { %p35_p0 = scmp.ge.s32.totalorder %s33_s16, 2  ;;  %s48_s17 = sadd.s32 1, %s676_s11 }
   0x8   : > { %p55_p1 = scmp.ne.s32.totalorder %s676_s11, %s672_s10  ;;  %p56_p2 = scmp.eq.s32.totalorder %s688_s14, 0 }
   0x9   : > { %s855_s16 = smov (%p35_p0, %s33_s16), 0  ;;  %p61_p4 = scmp.ne.s32.totalorder %s672_s10, %s668_s9 }
   0xa   : > { %p57_p3 = por %p56_p2, %p55_p1  ;;  %s43_s18 = ssub.s32 %s684_s13, %s855_s16 }
   0xb   : > { %p62_p5 = scmp.eq.s32.totalorder %s487_s15, 0  ;;  %p46_p6 = scmp.eq.s32.totalorder %s43_s18, 0 }
   0xc   : > { %p518_p8 = scmp.lt.s32.totalorder %s688_s14, 2  ;;  %s758_s21 = sand.u32 1, %s676_s11  }
   0xd   : > { %p749_p7 = por %p62_p5, %p61_p4  ;;  %s505_s22 = smul.u32 96, %s684_s13 }
   0xe   : > { %s755_s20 = scalar_select %p46_p6, %s676_s11, %s48_s17  }
   0xf   : > { %s504_s23 = smul.u32 6, %s758_s21  ;;  %s155_s26 = scalar_lea.hbm %s843_s0, %s505_s22 }
  0x10   : > { %p765_p9 = pnand %p518_p8, %p57_p3  ;;  %s144_s30 = scalar_lea.sflag [#allocation3], %s758_s21 }
  0x11   : > { %s147_s28 = scalar_lea.vmem [#allocation2], %s504_s23  ;;  %s690_s4 = smov [#allocation2]  }
  0x12   : > { %s156_s29 = sshll.u32 %s147_s28, 4  ;;  %p580_p10 = pneg %p765_p9  ;;  %s157_s29 = int_to_ptr.vmem [resolvable:$true] %s156_s29 }
  0x13   : > { %s591_s3 = scalar_lea.vmem %s157_s29, 96  ;;  %s596_s5 = sshll.u32 %s690_s4, 4  ;;  %s597_s5 = int_to_ptr.vmem [resolvable:$false] %s596_s5 }
  0x14   : > { %p592_p11 = scmp.ne.s32.totalorder %s157_s29, %s591_s3  ;;  %s598_s6 = scalar_lea.vmem %s597_s5, 192 }
  0x15   : > { %p599_p0 = scmp.lt.s32.totalorder %s157_s29, %s597_s5  ;;  %p600_p1 = scmp.lt.s32.totalorder %s598_s6, %s591_s3 }
  0x16   : > { %p594_p12 = pnand %p592_p11, %p580_p10 }
  0x17   : > { %p601_p2 = por %p600_p1, %p599_p0 }
  0x18   : > { %p595_p13 = pneg %p594_p12 }
  0x1a   : > { %p602_p3 = pnand %p601_p2, %p595_p13 }
  0x1c   : > { %605 = shalt.err (!%p602_p3)
}
  0x1d   : > { %s691_s7 = smov 32   ;;  %s692_s8 = smov 2  }
  0x1e   : > { %514 = dma.hbm_to_vmem [thread:$0]  (!%p765_p9), %s155_s26, 96, %s157_s29, %s144_s30, %s691_s7, %s691_s7, %s692_s8  }
  0x1f   : > { %p494_p4 = scmp.ge.s32.totalorder %s688_s14, 1  ;;  %p184_p5 = scmp.lt.s32.totalorder %s688_s14, 3 }
  0x20   : > { %s492_s9 = sshll.u32 %s758_s21, 1  ;;  %s493_s17 = sshll.u32 %s684_s13, 5 }
  0x21   : > { %p780_p6 = pnand %p494_p4, %p184_p5  ;;  %s170_s18 = scalar_lea.vmem [#allocation4], %s492_s9 }
  0x22   : > { %s179_s22 = sshll.u32 %s170_s18, 4  ;;  %s177_s25 = scalar_lea.hbm %s844_s1, %s493_s17  ;;  %s180_s22 = int_to_ptr.vmem [resolvable:$true] %s179_s22 }
  0x23   : > { %s167_s28 = scalar_lea.sflag [#allocation5], %s758_s21  ;;  %s619_s3 = scalar_lea.vmem %s180_s22, 32 }
  0x24   : > { %p620_p8 = scmp.ne.s32.totalorder %s180_s22, %s619_s3  ;;  %s693_s26 = smov [#allocation4]  }
  0x25   : > { %s624_s29 = sshll.u32 %s693_s26, 4  ;;  %s625_s29 = int_to_ptr.vmem [resolvable:$false] %s624_s29 }
  0x26   : > { %p622_p11 = pnand %p620_p8, %p580_p10  ;;  %s626_s30 = scalar_lea.vmem %s625_s29, 64 }
  0x27   : > { %p627_p13 = scmp.lt.s32.totalorder %s180_s22, %s625_s29  ;;  %p628_p0 = scmp.lt.s32.totalorder %s626_s30, %s619_s3 }
  0x28   : > { %p623_p12 = pneg %p622_p11 }
  0x29   : > { %p629_p1 = por %p628_p0, %p627_p13 }
  0x2b   : > { %p630_p2 = pnand %p629_p1, %p623_p12 }
  0x2d   : > { %633 = shalt.err (!%p630_p2)
}
  0x2e   : > { %517 = dma.hbm_to_vmem [thread:$0]  (!%p765_p9), %s177_s25, 32, %s180_s22, %s167_s28  }
  0x2f   : > { %188 = sbr.rel (%p780_p6) target bundleno = 132 (0x84), region = 28  ;;  %s190_s21 = sand.u32 (!%p780_p6), 1, %s672_s10  }
  0x30   : > { %s506_s4 = smul.u32 (!%p780_p6), 6, %s190_s21  ;;  %s191_s5 = scalar_lea.sflag (!%p780_p6), [#allocation3], %s190_s21 }
  0x32   : > { %s194_s6 = scalar_lea.vmem (!%p780_p6), [#allocation2], %s506_s4 }
  0x34   : > { %659 = dma.done.wait (%p749_p7), %s191_s5, 96  }
  0x35   : > { %661 = vsyncadd (%p749_p7), %s191_s5, 4294967200  ;;  %s495_s7 = sshll.u32 %s190_s21, 1  ;;  %s200_s8 = scalar_lea.sflag [#allocation5], %s190_s21 }
  0x36   : > { %s203_s9 = scalar_lea.vmem [#allocation4], %s495_s7 }
  0x37   : > { %663 = dma.done.wait (%p749_p7), %s200_s8, 32  }
  0x38   : > { %665 = vsyncadd (%p749_p7), %s200_s8, 4294967264  ;;  %p236_p9 = scmp.lt.s32.totalorder %s680_s12, 1  ;;  %v694_v0 = vmov 0.0   ;;  %v247_v1 = vld [vmem:[%s194_s6] sm:$0x3]  ;;  %vm275_vm2 = vcmask 1041408  }
  0x39   : > { %v497_v2 = vld [vmem:[%s194_s6 + $0x2] sm:$0x3]  ;;  %v498_v3 = vld [vmem:[%s194_s6 + $0x4] sm:$0x3]  ;;  %v252_v16 = vld [vmem:[%s203_s9] sm:$0x3] }
  0x3a   : > { %s857_s12 = smov (!%p236_p9, %s680_s12), 1  ;;  %v253_v4 = vmax.f32 %v247_v1, %v497_v2  ;;  %vm271_vm0 = vcmp.eq.s32.totalorder %v252_v16, 0  ;;  %vm300_vm1 = vcmp.eq.s32.totalorder %v252_v16, 1  ;;  %vm328_vm3 = vcmp.eq.s32.totalorder %v252_v16, 2 }
  0x3b   : > { %s496_s27 = sshll.u32 %s857_s12, 3  ;;  %v499_v18 = vsel %vm271_vm0, 1.0, %v694_v0  ;;  %v500_v19 = vsel %vm300_vm1, 1.0, %v694_v0  ;;  %v501_v22 = vsel %vm328_vm3, 1.0, %v694_v0  ;;  %vm355_vm4 = vcmask 1040384  }
  0x3c   : > { %s810_s18 = scalar_lea.vmem %s845_s2, %s496_s27  ;;  %v254_v5 = vmax.f32 %v253_v4, %v498_v3  ;;  %v290_v20 = vsel %vm275_vm2, %v499_v18, 0.0  ;;  %v318_v21 = vsel %vm275_vm2, %v500_v19, 0.0  ;;  %v346_v25 = vsel %vm275_vm2, %v501_v22, 0.0 }
  0x3d   : > { %246 = vst [vmem:[%s810_s18] sm:$0x3f] %v694_v0  ;;  %v291_v23 = vrot.slane %v290_v20, 4  ;;  %v319_v24 = vrot.slane %v318_v21, 4  ;;  %v347_v26 = vrot.slane %v346_v25, 4  ;;  %vm358_vm5 = vcmask 1042432  }
  0x3e   : > { %v255_v6 = vsub.f32 %v247_v1, %v254_v5  ;;  %v258_v7 = vsub.f32 %v497_v2, %v254_v5  ;;  %v261_v8 = vsub.f32 %v498_v3, %v254_v5  ;;  %vm360_vm6 = vcmask 1043456  }
  0x3f   : > { %v292_v28 = vadd.f32 %v291_v23, %v290_v20  ;;  %v320_v29 = vadd.f32 %v319_v24, %v318_v21  ;;  %v348_v32 = vadd.f32 %v347_v26, %v346_v25  ;;  %vm362_vm7 = vcmask 1044480  }
  0x40   : > { %v256_v9 = vmul.f32 1.442695, %v255_v6  ;;  %v259_v10 = vmul.f32 1.442695, %v258_v7  ;;  %v262_v11 = vmul.f32 1.442695, %v261_v8 }
  0x41   : > { %v293_v33 = vrot.slane %v292_v28, 2  ;;  %v321_v34 = vrot.slane %v320_v29, 2  ;;  %v349_v39 = vrot.slane %v348_v32, 2 }
  0x42   : > { %570 = vpow2.f32 %v256_v9 }
  0x43   : > { %572 = vpow2.f32 %v259_v10  ;;  %v294_v40 = vadd.f32 %v293_v33, %v292_v28  ;;  %v322_v41 = vadd.f32 %v321_v34, %v320_v29  ;;  %v350_v53 = vadd.f32 %v349_v39, %v348_v32 }
  0x44   : > { %574 = vpow2.f32 %v262_v11  ;;  %v364_v39 = vld [vmem:[%s810_s18] sm:$0x3f] }
  0x45   : > { %v295_v58 = vrot.slane %v294_v40, 1  ;;  %v323_v59 = vrot.slane %v322_v41, 1  ;;  %v351_v4 = vrot.slane %v350_v53, 1 }
  0x47   : > { %v296_v9 = vadd.f32 %v295_v58, %v294_v40  ;;  %v324_v10 = vadd.f32 %v323_v59, %v322_v41 }
  0x4f   : > { %v571_v12 = vpop.eup %570 }
  0x50   : > { %v573_v13 = vpop.eup %572 }
  0x51   : > { %v575_v14 = vpop.eup %574  ;;  %v264_v15 = vadd.f32 %v573_v13, %v571_v12 }
  0x53   : > { %v265_v17 = vadd.f32 %v575_v14, %v264_v15 }
  0x55   : > { %576 = vrcp.f32 %v265_v17 }
  0x62   : > { %v577_v27 = vpop.eup %576 }
  0x63   : > { %v267_v30 = vmul.f32 %v577_v27, %v265_v17 }
  0x65   : > { %v268_v31 = vsub.f32 2.0, %v267_v30 }
  0x67   : > { %v269_v35 = vmul.f32 %v577_v27, %v268_v31 }
  0x69   : > { %v270_v36 = vmul.f32 %v571_v12, %v269_v35  ;;  %v299_v37 = vmul.f32 %v573_v13, %v269_v35  ;;  %v327_v38 = vmul.f32 %v575_v14, %v269_v35 }
  0x6b   : > { %v274_v42 = vmul.f32 %v499_v18, %v270_v36  ;;  %v283_v43 = vsel %vm275_vm2, %v270_v36, 0.0  ;;  %v303_v44 = vmul.f32 %v500_v19, %v299_v37  ;;  %v311_v45 = vsel %vm275_vm2, %v299_v37, 0.0 }
  0x6c   : > { %v284_v46 = vrot.slane %v283_v43, 4  ;;  %v312_v47 = vrot.slane %v311_v45, 4  ;;  %v331_v48 = vmul.f32 %v501_v22, %v327_v38  ;;  %v339_v49 = vsel %vm275_vm2, %v327_v38, 0.0 }
  0x6d   : > { %v276_v50 = vsel %vm275_vm2, %v274_v42, 0.0  ;;  %v304_v51 = vsel %vm275_vm2, %v303_v44, 0.0  ;;  %v340_v52 = vrot.slane %v339_v49, 4  ;;  %v352_v19 = vadd.f32 %v351_v4, %v350_v53 }
  0x6e   : > { %v277_v54 = vrot.slane %v276_v50, 4  ;;  %v285_v55 = vadd.f32 %v284_v46, %v283_v43  ;;  %v305_v56 = vrot.slane %v304_v51, 4  ;;  %v313_v57 = vadd.f32 %v312_v47, %v311_v45 }
  0x6f   : > { %v332_v60 = vsel %vm275_vm2, %v331_v48, 0.0  ;;  %v341_v61 = vadd.f32 %v340_v52, %v339_v49 }
  0x70   : > { %v278_v62 = vadd.f32 %v277_v54, %v276_v50  ;;  %v286_v63 = vrot.slane %v285_v55, 2  ;;  %v306_v0 = vadd.f32 %v305_v56, %v304_v51  ;;  %v314_v1 = vrot.slane %v313_v57, 2 }
  0x71   : > { %v333_v2 = vrot.slane %v332_v60, 4  ;;  %v342_v3 = vrot.slane %v341_v61, 2 }
  0x72   : > { %v279_v5 = vrot.slane %v278_v62, 2  ;;  %v287_v6 = vadd.f32 %v286_v63, %v285_v55  ;;  %v307_v7 = vrot.slane %v306_v0, 2  ;;  %v315_v8 = vadd.f32 %v314_v1, %v313_v57 }
  0x73   : > { %v334_v11 = vadd.f32 %v333_v2, %v332_v60  ;;  %v343_v12 = vadd.f32 %v342_v3, %v341_v61 }
  0x74   : > { %v280_v13 = vadd.f32 %v279_v5, %v278_v62  ;;  %v288_v14 = vrot.slane %v287_v6, 1  ;;  %v308_v15 = vadd.f32 %v307_v7, %v306_v0  ;;  %v316_v16 = vrot.slane %v315_v8, 1 }
  0x75   : > { %v335_v17 = vrot.slane %v334_v11, 2  ;;  %v344_v18 = vrot.slane %v343_v12, 1 }
  0x76   : > { %v281_v20 = vrot.slane %v280_v13, 1  ;;  %v289_v21 = vadd.f32 %v288_v14, %v287_v6  ;;  %v309_v22 = vrot.slane %v308_v15, 1  ;;  %v317_v23 = vadd.f32 %v316_v16, %v315_v8 }
  0x77   : > { %v336_v24 = vadd.f32 %v335_v17, %v334_v11  ;;  %v345_v25 = vadd.f32 %v344_v18, %v343_v12 }
  0x78   : > { %v282_v26 = vadd.f32 %v281_v20, %v280_v13  ;;  %v297_v27 = vadd.f32 %v296_v9, %v289_v21  ;;  %v310_v28 = vadd.f32 %v309_v22, %v308_v15  ;;  %v325_v29 = vadd.f32 %v324_v10, %v317_v23 }
  0x79   : > { %v337_v30 = vrot.slane %v336_v24, 1  ;;  %v353_v31 = vadd.f32 %v352_v19, %v345_v25 }
  0x7a   : > { %v298_v32 = vsub.f32 %v297_v27, %v282_v26  ;;  %v356_v33 = vsel %vm355_vm4, %v282_v26, %v310_v28  ;;  %v326_v34 = vsub.f32 %v325_v29, %v310_v28 }
  0x7b   : > { %v338_v35 = vadd.f32 %v337_v30, %v336_v24 }
  0x7d   : > { %v354_v36 = vsub.f32 %v353_v31, %v338_v35  ;;  %v357_v37 = vsel %vm275_vm2, %v356_v33, %v338_v35 }
  0x7e   : > { %v359_v38 = vsel %vm358_vm5, %v357_v37, %v298_v32 }
  0x7f   : > { %v361_v40 = vsel %vm360_vm6, %v359_v38, %v326_v34 }
  0x80   : > { %v363_v41 = vsel %vm362_vm7, %v361_v40, %v354_v36 }
  0x81   : > { %v365_v42 = vadd.f32 %v364_v39, %v363_v41 }
  0x83   : > { %366 = vst [vmem:[%s810_s18] sm:$0x3f] %v365_v42 }
  0x84 PF: > { %s18_s14 = sadd.s32 1, %s688_s14   ;;  %s849_s9 = smov %s672_s10 }
  0x85   : > { %p15_p7 = scmp.ge.s32.totalorder %s18_s14, 4   ;;  %s850_s10 = smov %s676_s11 }
  0x86   : > { %s851_s11 = smov %s755_s20  ;;  %s852_s12 = smov %s684_s13 }
  0x87   : > { %s853_s13 = smov %s855_s16  ;;  %17 = sbr.rel (!%p15_p7) target bundleno = 6 (0x6), region = 87 }
  0x8c   :  { %394 = vsyncpa [#allocation3], 1 }
  0x8d   :  { %396 = vsyncpa [#allocation3 + $0x1], 1 }
  0x8e   :  { %397 = vsyncpa [#allocation5], 1 }
  0x8f   :  { %399 = vsyncpa [#allocation5 + $0x1], 1 }

</bundles_post_ra>
